<compile_context>
chip_gen: v6e
topology: v6e:2x2x1
jax: 0.10.0
libtpu: 0.0.40
codegen_flags: <defaults>
</compile_context>

<pallas_src>
import functools

import jax
import jax.numpy as jnp
from jax.experimental import pallas as pl
from jax.experimental.pallas import tpu as pltpu

TEMPERATURE = 0.3
INV_T = 1.0 / TEMPERATURE


def _cdiv(a, b):
    return (a + b - 1) // b


def _round_up(x, m):
    return _cdiv(x, m) * m


def _icl_lse_kernel(s_ref, t_ref, out_ref, m_sc, l_sc, *, n_valid_cols,
                    mask_cols):
    """Flash (online) logsumexp over one (TM rows) x (TN cols) tile of sim/T."""
    j = pl.program_id(1)
    nj = pl.num_programs(1)

    @pl.when(j == 0)
    def _init():
        m_sc[...] = jnp.full(m_sc.shape, -jnp.inf, dtype=m_sc.dtype)
        l_sc[...] = jnp.zeros(l_sc.shape, dtype=l_sc.dtype)

    s = s_ref[...]                      # (TM, D), native dtype -> MXU directly
    t = t_ref[...]                      # (TN, D)

    # sim_t[c, r] = <feat_t[c], feat_s[r]> / T   -> (TN, TM), f32 accumulation.
    # Transposed orientation keeps per-row statistics lane-dense: rows of
    # feat_s live along lanes, so max/sum reduce over sublanes into (1, TM).
    sim = jax.lax.dot_general(
        t, s,
        dimension_numbers=(((1,), (1,)), ((), ())),
        preferred_element_type=jnp.float32,
    ) * INV_T

    if mask_cols:
        # Padded feat_t rows (global column index >= B) must not contribute.
        tn = t_ref.shape[0]
        col = j * tn + jax.lax.broadcasted_iota(jnp.int32, sim.shape, 0)
        sim = jnp.where(col < n_valid_cols, sim, -jnp.inf)

    # Online logsumexp update for this column tile.
    m_prev = m_sc[...]                                       # (1, TM)
    m_new = jnp.maximum(m_prev, jnp.max(sim, axis=0, keepdims=True))
    l_sc[...] = (jnp.exp(m_prev - m_new) * l_sc[...]
                 + jnp.sum(jnp.exp(sim - m_new), axis=0, keepdims=True))
    m_sc[...] = m_new

    @pl.when(j == nj - 1)
    def _finalize():
        out_ref[...] = m_sc[...] + jnp.log(l_sc[...])        # lane-dense (1, TM)


def _choose_tiles(B, D, itemsize, tm_pref, tn_pref, vmem_budget):
    """Pick (TM, TN): TM large (HBM lever), TN MXU-native, within VMEM budget."""
    gran = 8 if itemsize >= 4 else 16           # sublane packing granularity
    tn = max(min(tn_pref, _round_up(B, gran)), gran)
    tm = max(min(tm_pref, _round_up(B, gran)), gran)

    def vmem_needed(tm_, tn_):
        # double-buffered input tiles + f32 sim temporary + stats/out (rough)
        return 2 * (tm_ + tn_) * D * itemsize + tm_ * tn_ * 4 + 16 * tm_ * 4

    # Shrink TM first (keeps the MXU-native TN), then TN, until it fits.
    while vmem_needed(tm, tn) > vmem_budget and tm > max(tn, gran):
        tm = max(_round_up(tm // 2, gran), gran)
    while vmem_needed(tm, tn) > vmem_budget and tn > gran:
        tn = max(_round_up(tn // 2, gran), gran)
    # TODO(synk): for very large D (>~8K) where even minimal (tm, D) tiles bust
    # the v7x 64 MiB VMEM budget, add a third 'arbitrary' grid axis over D
    # (K-tiling) with a (TN, TM) f32 accumulator in scratch; D stays whole here.

    # Prefer an even row-tile count so the 'parallel' row axis splits evenly
    # across v7x's two TensorCores (neutral on v5e/v6e single-TC chips).
    n_row_tiles = _cdiv(B, tm)
    if (n_row_tiles > 1 and n_row_tiles % 2 == 1
            and tm // 2 >= max(tn, gran) and (tm // 2) % gran == 0):
        tm //= 2
    return tm, tn


def icl_loss(feat_s, feat_t, *, tm_pref=512, tn_pref=256, cast_to_bf16=False,
             vmem_budget_bytes=40 * 1024 * 1024):
    """Pallas TPU implementation of IclLoss.forward(feat_s, feat_t).

    feat_s / feat_t: (B, D) feature matrices (any float dtype; bf16 is fed
    straight to the MXU).  `tm_pref` / `tn_pref` are preferred row / column
    tile sizes; `cast_to_bf16=True` casts f32 MXU operands to bf16 (f32
    accumulation is kept).
    """
    assert feat_s.ndim == 2 and feat_s.shape == feat_t.shape
    B, D = feat_s.shape

    # Positive logit sim[i, i] / T: trivial O(B*D) elementwise dot in f32 done
    # outside the kernel (frees TM from TN and removes per-tile diagonal work).
    pos = jnp.sum(feat_s.astype(jnp.float32) * feat_t.astype(jnp.float32),
                  axis=1) * INV_T

    s_op, t_op = feat_s, feat_t
    if cast_to_bf16 and s_op.dtype == jnp.float32:
        s_op = s_op.astype(jnp.bfloat16)
        t_op = t_op.astype(jnp.bfloat16)

    itemsize = jnp.dtype(s_op.dtype).itemsize
    tm, tn = _choose_tiles(B, D, itemsize, tm_pref, tn_pref, vmem_budget_bytes)

    rows_pad = _round_up(B, tm)
    cols_pad = _round_up(B, tn)
    if rows_pad != B:
        s_op = jnp.pad(s_op, ((0, rows_pad - B), (0, 0)))   # padded rows dropped later
    if cols_pad != B:
        t_op = jnp.pad(t_op, ((0, cols_pad - B), (0, 0)))   # padded cols masked to -inf

    grid = (rows_pad // tm, cols_pad // tn)

    kernel = functools.partial(
        _icl_lse_kernel, n_valid_cols=B, mask_cols=(cols_pad != B))

    vmem_need = 2 * (tm + tn) * D * itemsize + tm * tn * 4 + 16 * tm * 4
    vmem_limit = int(min(max(vmem_need + (8 << 20), 16 << 20), 56 << 20))

    lse_tiles = pl.pallas_call(
        kernel,
        out_shape=jax.ShapeDtypeStruct((grid[0], tm), jnp.float32),
        grid_spec=pltpu.PrefetchScalarGridSpec(
            num_scalar_prefetch=0,
            grid=grid,
            in_specs=[
                pl.BlockSpec((tm, D), lambda i, j: (i, 0)),   # feat_s row tile (resident over j)
                pl.BlockSpec((tn, D), lambda i, j: (j, 0)),   # feat_t tile (streamed)
            ],
            out_specs=pl.BlockSpec((1, tm), lambda i, j: (i, 0)),
            scratch_shapes=[
                pltpu.VMEM((1, tm), jnp.float32),   # running max
                pltpu.VMEM((1, tm), jnp.float32),   # running sum of exp
            ],
        ),
        compiler_params=pltpu.CompilerParams(
            dimension_semantics=("parallel", "arbitrary"),
            vmem_limit_bytes=vmem_limit,
        ),
        cost_estimate=pl.CostEstimate(
            flops=2 * rows_pad * cols_pad * D,
            transcendentals=rows_pad * cols_pad,
            bytes_accessed=(rows_pad * D + grid[0] * cols_pad * D) * itemsize
            + grid[0] * tm * 4,
        ),
    )(s_op, t_op)

    lse = lse_tiles.reshape(-1)[:B]          # drop padded feat_s rows
    return jnp.mean(lse - pos)


def _icl_loss_ref(feat_s, feat_t):
    # Pure-JAX reference mirroring the PyTorch code path, for validation.
    s = feat_s.astype(jnp.float32)
    t = feat_t.astype(jnp.float32)
    sim = (s @ t.T) * INV_T
    pos = jnp.diagonal(sim)
    lse = jax.scipy.special.logsumexp(sim, axis=1)
    return jnp.mean(lse - pos)


if __name__ == "__main__":
    key = jax.random.PRNGKey(0)
    k1, k2 = jax.random.split(key)

    # --- tiny shape: single-tile path ---------------------------------------
    B, D = 16, 128
    feat_s = jax.random.normal(k1, (B, D), dtype=jnp.float32)
    feat_t = jax.random.normal(k2, (B, D), dtype=jnp.float32)

    loss = icl_loss(feat_s, feat_t)
    jax.block_until_ready(loss)
    ref = _icl_loss_ref(feat_s, feat_t)
    assert jnp.allclose(loss, ref, rtol=1e-3, atol=1e-3), (loss, ref)

    # --- awkward B: multi-tile grid, row/col padding and -inf column mask ---
    B2 = 40
    k3, k4 = jax.random.split(k1)
    s2 = jax.random.normal(k3, (B2, D), dtype=jnp.float32)
    t2 = jax.random.normal(k4, (B2, D), dtype=jnp.float32)
    loss2 = icl_loss(s2, t2, tm_pref=16, tn_pref=16)
    jax.block_until_ready(loss2)
    ref2 = _icl_loss_ref(s2, t2)
    assert jnp.allclose(loss2, ref2, rtol=1e-3, atol=1e-3), (loss2, ref2)

    # --- bf16 inputs: fed straight to the MXU, f32 accumulation -------------
    loss_bf = icl_loss(s2.astype(jnp.bfloat16), t2.astype(jnp.bfloat16),
                       tm_pref=16, tn_pref=16)
    jax.block_until_ready(loss_bf)
    ref_bf = _icl_loss_ref(s2.astype(jnp.bfloat16), t2.astype(jnp.bfloat16))
    assert jnp.allclose(loss_bf, ref_bf, rtol=1e-2, atol=1e-2), (loss_bf, ref_bf)

    # --- f32 inputs with bf16 MXU-operand cast (HBM / MXU fast path) --------
    loss_cast = icl_loss(s2, t2, tm_pref=16, tn_pref=16, cast_to_bf16=True)
    jax.block_until_ready(loss_cast)
    assert jnp.allclose(loss_cast, ref2, rtol=3e-2, atol=3e-2), (loss_cast, ref2)

    print("KERNEL_OK")
</pallas_src>

<mosaic_0001>
module attributes {stable_mosaic.version = 11 : i64} {
  func.func @_icl_lse_kernel(%arg0: i32, %arg1: i32, %arg2: memref<16x128xf32, #tpu.memory_space<vmem>>, %arg3: memref<16x128xf32, #tpu.memory_space<vmem>>, %arg4: memref<1x16xf32, #tpu.memory_space<vmem>>, %arg5: memref<1x16xf32, #tpu.memory_space<vmem>>, %arg6: memref<1x16xf32, #tpu.memory_space<vmem>>) attributes {dimension_semantics = [#tpu.dimension_semantics<parallel>, #tpu.dimension_semantics<arbitrary>], iteration_bounds = array<i64: 1, 1>, scalar_prefetch = 0 : i64, scratch_operands = 2 : i64, tpu.core_type = #tpu.core_type<tc>, window_params = [{transform_indices = @transform_0, window_bounds = array<i64: 16, 128>}, {transform_indices = @transform_1, window_bounds = array<i64: 16, 128>}, {transform_indices = @transform_2, window_bounds = array<i64: 1, 16>}]} {
    %c0_i32 = arith.constant 0 : i32
    %0 = arith.cmpi eq, %arg1, %c0_i32 : i32
    %1 = arith.extui %0 : i1 to i32
    %c0_i32_0 = arith.constant 0 : i32
    %2 = arith.cmpi ne, %1, %c0_i32_0 : i32
    scf.if %2 {
      %cst_17 = arith.constant 0xFF800000 : f32
      %27 = vector.broadcast %cst_17 : f32 to vector<1x16xf32>
      %c0_18 = arith.constant 0 : index
      %c0_19 = arith.constant 0 : index
      %28 = vector.load %arg5[%c0_18, %c0_19] : memref<1x16xf32, #tpu.memory_space<vmem>>, vector<1x16xf32>
      tpu.vector_store %arg5[%c0_18, %c0_19], %27 {strides = array<i32>} : memref<1x16xf32, #tpu.memory_space<vmem>>, vector<1x16xf32>,
      %cst_20 = arith.constant 0.000000e+00 : f32
      %29 = vector.broadcast %cst_20 : f32 to vector<1x16xf32>
      %c0_21 = arith.constant 0 : index
      %c0_22 = arith.constant 0 : index
      %30 = vector.load %arg6[%c0_21, %c0_22] : memref<1x16xf32, #tpu.memory_space<vmem>>, vector<1x16xf32>
      tpu.vector_store %arg6[%c0_21, %c0_22], %29 {strides = array<i32>} : memref<1x16xf32, #tpu.memory_space<vmem>>, vector<1x16xf32>,
    } else {
    }
    %c0 = arith.constant 0 : index
    %c0_1 = arith.constant 0 : index
    %3 = vector.load %arg2[%c0, %c0_1] : memref<16x128xf32, #tpu.memory_space<vmem>>, vector<16x128xf32>
    %c0_2 = arith.constant 0 : index
    %c0_3 = arith.constant 0 : index
    %4 = vector.load %arg3[%c0_2, %c0_3] : memref<16x128xf32, #tpu.memory_space<vmem>>, vector<16x128xf32>
    %cst = arith.constant dense<0.000000e+00> : vector<16x16xf32>
    %5 = tpu.matmul %4, %3, %cst {dimension_numbers = #tpu.dot_dimension_numbers<[1], [1], [0], [0], [0, 0, 1, 0], [], []>} : vector<16x128xf32>, vector<16x128xf32>, vector<16x16xf32> -> vector<16x16xf32>
    %cst_4 = arith.constant 3.33333325 : f32
    %6 = vector.broadcast %cst_4 : f32 to vector<16x16xf32>
    %7 = arith.mulf %5, %6 : vector<16x16xf32>
    %c0_5 = arith.constant 0 : index
    %c0_6 = arith.constant 0 : index
    %8 = vector.load %arg5[%c0_5, %c0_6] : memref<1x16xf32, #tpu.memory_space<vmem>>, vector<1x16xf32>
    %cst_7 = arith.constant dense<0xFF800000> : vector<16xf32>
    %9 = vector.multi_reduction <maximumf>, %7, %cst_7 [0] : vector<16x16xf32> to vector<16xf32>
    %10 = vector.shape_cast %9 : vector<16xf32> to vector<1x16xf32>
    %11 = arith.maximumf %8, %10 : vector<1x16xf32>
    %12 = arith.subf %8, %11 : vector<1x16xf32>
    %13 = math.exp %12 : vector<1x16xf32>
    %c0_8 = arith.constant 0 : index
    %c0_9 = arith.constant 0 : index
    %14 = vector.load %arg6[%c0_8, %c0_9] : memref<1x16xf32, #tpu.memory_space<vmem>>, vector<1x16xf32>
    %15 = arith.mulf %13, %14 : vector<1x16xf32>
    %16 = vector.broadcast %11 : vector<1x16xf32> to vector<16x16xf32>
    %17 = arith.subf %7, %16 : vector<16x16xf32>
    %18 = math.exp %17 : vector<16x16xf32>
    %cst_10 = arith.constant dense<0.000000e+00> : vector<16xf32>
    %19 = vector.multi_reduction <add>, %18, %cst_10 [0] : vector<16x16xf32> to vector<16xf32>
    %20 = vector.shape_cast %19 : vector<16xf32> to vector<1x16xf32>
    %21 = arith.addf %15, %20 : vector<1x16xf32>
    %c0_11 = arith.constant 0 : index
    %c0_12 = arith.constant 0 : index
    %22 = vector.load %arg6[%c0_11, %c0_12] : memref<1x16xf32, #tpu.memory_space<vmem>>, vector<1x16xf32>
    tpu.vector_store %arg6[%c0_11, %c0_12], %21 {strides = array<i32>} : memref<1x16xf32, #tpu.memory_space<vmem>>, vector<1x16xf32>,
    %c0_13 = arith.constant 0 : index
    %c0_14 = arith.constant 0 : index
    %23 = vector.load %arg5[%c0_13, %c0_14] : memref<1x16xf32, #tpu.memory_space<vmem>>, vector<1x16xf32>
    tpu.vector_store %arg5[%c0_13, %c0_14], %11 {strides = array<i32>} : memref<1x16xf32, #tpu.memory_space<vmem>>, vector<1x16xf32>,
    %c0_i32_15 = arith.constant 0 : i32
    %24 = arith.cmpi eq, %arg1, %c0_i32_15 : i32
    %25 = arith.extui %24 : i1 to i32
    %c0_i32_16 = arith.constant 0 : i32
    %26 = arith.cmpi ne, %25, %c0_i32_16 : i32
    scf.if %26 {
      %c0_17 = arith.constant 0 : index
      %c0_18 = arith.constant 0 : index
      %27 = vector.load %arg5[%c0_17, %c0_18] : memref<1x16xf32, #tpu.memory_space<vmem>>, vector<1x16xf32>
      %c0_19 = arith.constant 0 : index
      %c0_20 = arith.constant 0 : index
      %28 = vector.load %arg6[%c0_19, %c0_20] : memref<1x16xf32, #tpu.memory_space<vmem>>, vector<1x16xf32>
      %29 = math.log %28 : vector<1x16xf32>
      %30 = arith.addf %27, %29 : vector<1x16xf32>
      %c0_21 = arith.constant 0 : index
      %c0_22 = arith.constant 0 : index
      %31 = vector.load %arg4[%c0_21, %c0_22] : memref<1x16xf32, #tpu.memory_space<vmem>>, vector<1x16xf32>
      tpu.vector_store %arg4[%c0_21, %c0_22], %30 {strides = array<i32>} : memref<1x16xf32, #tpu.memory_space<vmem>>, vector<1x16xf32>,
    } else {
    }
    return
  }
  func.func @transform_0(%arg0: i32, %arg1: i32) -> (i32, i32) {
    %c0_i32 = arith.constant 0 : i32
    %c0_i32_0 = arith.constant 0 : i32
    return %arg0, %c0_i32 : i32, i32
  }
  func.func @transform_1(%arg0: i32, %arg1: i32) -> (i32, i32) {
    %c0_i32 = arith.constant 0 : i32
    %c0_i32_0 = arith.constant 0 : i32
    return %arg1, %c0_i32 : i32, i32
  }
  func.func @transform_2(%arg0: i32, %arg1: i32) -> (i32, i32) {
    %c0_i32 = arith.constant 0 : i32
    %c0_i32_0 = arith.constant 0 : i32
    return %arg0, %c0_i32 : i32, i32
  }
}

</mosaic_0001>

<bundles_post_ra>
// kernel: tpu_custom_call.1
= control target key start
LH: loop header
LB: loop body
LE: loop exit
PB: predicated region body
PF: predicated region fallthrough
CT: control target
= control target key end

     0   :  { %7 = vsyncpa [#allocation5], 0  ;;  %s327_s0 = inlined_call_operand.hbm [shape: f32[16,128], index: 0, kind: input, shape index: {}]   ;;  %s328_s1 = inlined_call_operand.hbm [shape: f32[16,128], index: 1, kind: input, shape index: {}]   ;;  %s329_s2 = inlined_call_operand.hbm [shape: f32[1,16], index: 2, kind: output, shape index: {}]  }
   0x1   :  { %8 = vsyncpa [#allocation8], 0 }
   0x2   :  { %9 = vsyncpa [#allocation6], 0  ;;  %s287_s9 = smov [#allocation4]  }
   0x3   :  { %s15_s10 = sshll.u32 %s287_s9, 4  ;;  %s16_s10 = int_to_ptr.vmem [resolvable:$true] %s15_s10 }
   0x4   :  { %s229_s11 = scalar_lea.vmem %s16_s10, 256  ;;  %p234_p1 = scmp.lt.s32.totalorder %s16_s10, %s16_s10 }
   0x5   :  { %p230_p0 = scmp.ne.s32.totalorder %s16_s10, %s229_s11  ;;  %p235_p2 = scmp.lt.s32.totalorder %s229_s11, %s229_s11 }
   0x7   :  { %p236_p3 = por %p235_p2, %p234_p1 }
   0x9   :  { %p237_p4 = pnand %p236_p3, %p230_p0 }
   0xb   :  { %240 = shalt.err (!%p237_p4)
}
   0xc   :  { %s288_s12 = smov 128   ;;  %s289_s13 = smov 8  }
   0xd   :  { %21 = dma.hbm_to_vmem [thread:$0]  %s327_s0, 256, %s16_s10, [#allocation5], %s288_s12, %s288_s12, %s289_s13  }
   0xe   :  { %s290_s16 = smov [#allocation7]  }
   0xf   :  { %s27_s17 = sshll.u32 %s290_s16, 4  ;;  %s28_s17 = int_to_ptr.vmem [resolvable:$true] %s27_s17 }
  0x10   :  { %s249_s18 = scalar_lea.vmem %s28_s17, 256  ;;  %p254_p6 = scmp.lt.s32.totalorder %s28_s17, %s28_s17 }
  0x11   :  { %p250_p5 = scmp.ne.s32.totalorder %s28_s17, %s249_s18  ;;  %p255_p7 = scmp.lt.s32.totalorder %s249_s18, %s249_s18 }
  0x13   :  { %p256_p8 = por %p255_p7, %p254_p6 }
  0x15   :  { %p257_p9 = pnand %p256_p8, %p250_p5 }
  0x17   :  { %260 = shalt.err (!%p257_p9)
}
  0x18   :  { %33 = dma.hbm_to_vmem [thread:$0]  %s328_s1, 256, %s28_s17, [#allocation8], %s288_s12, %s288_s12, %s289_s13  }
  0x19   :  { %281 = dma.done.wait [#allocation5], 256  }
  0x1a   :  { %282 = vsyncadd [#allocation5], 4294967040 }
  0x1b   :  { %283 = dma.done.wait [#allocation8], 256  }
  0x1c   :  { %284 = vsyncadd [#allocation8], 4294967040  ;;  %v48_v0 = vld [vmem:[#allocation4 + $0x8] sm:$0xff]  ;;  %v47_v1 = vld [vmem:[#allocation4] sm:$0xff]  ;;  %vm44_vm0 = vcmask 122880   ;;  %v291_v4 = vmov -inf   ;;  %v146_v15 = vlaneseq }
  0x1d   :  { %v49_v2 = vld [vmem:[#allocation7] sm:$0xff]  ;;  %199 = vmatprep.subr.mxu0 %v48_v0  ;;  %v50_v3 = vld [vmem:[#allocation7 + $0x8] sm:$0xff]  ;;  %45 = vst.msk [vmem:[#allocation2] sm:$0x1] %vm44_vm0, %v291_v4  ;;  %v292_v5 = vmov 0.0   ;;  %vm129_vm1 = vcmask 130048  }
  0x1e   :  { %203 = vmatprep.mubr.f32.mxu0 %v49_v2  ;;  %200 = vmatpush3.xpose.msra.mxu0 %v48_v0  ;;  %46 = vst.msk [vmem:[#allocation3] sm:$0x1] %vm44_vm0, %v292_v5  ;;  %v147_v18 = vshrl.u32 %v146_v15, 7  ;;  %s293_s0 = smov [#allocation9]  }
  0x1f   :  { %201 = vmatprep.subr.mxu0 %v47_v1  ;;  %s185_s1 = sshll.u32 %s293_s0, 4  ;;  %s186_s1 = int_to_ptr.vmem [resolvable:$true] %s185_s1 }
  0x20   :  { %v148_v22 = vsub.s32 0, %v147_v18  ;;  %s261_s21 = scalar_lea.vmem %s186_s1, 16  ;;  %s265_s22 = scalar_lea.vmem %s186_s1, 32 }
  0x21   :  { %p262_p10 = scmp.ne.s32.totalorder %s186_s1, %s261_s21  ;;  %p266_p11 = scmp.lt.s32.totalorder %s186_s1, %s186_s1 }
  0x22   :  { %202 = vmatpush3.xpose.msra.mxu0 %v47_v1  ;;  %p267_p12 = scmp.lt.s32.totalorder %s265_s22, %s261_s21 }
  0x24   :  { %v128_v20 = vld [vmem:[#allocation2] sm:$0x1]  ;;  %p268_p13 = por %p267_p12, %p266_p11 }
  0x25   :  { %204 = vmatmul.mubr.f32.vlgmr.msra.gmra.mxu0 %v50_v3  ;;  %v143_v41 = vld [vmem:[#allocation3] sm:$0x1] }
  0x26   :  { %p269_p0 = pnand %p268_p13, %p262_p10 }
  0xe5   :  { %v205_v6 = vpop.f32.mrf.mxu0 }
  0xe6   :  { %v127_v7 = vmul.f32 3.3333333, %v205_v6 }
  0xe7   :  { %v117_v8 = vpop.f32.mrf.mxu0 }
  0xe8   :  { %v126_v9 = vmul.f32 3.3333333, %v117_v8  ;;  %v131_v10 = vsel %vm129_vm1, %v127_v7, -inf }
  0xea   :  { %v130_v11 = vsel %vm129_vm1, %v126_v9, -inf }
  0xeb   :  { %v132_v12 = vmax.f32 %v130_v11, %v131_v10 }
  0xed   :  { %v133_v13 = vrot.slane %v132_v12, 4 }
  0xef   :  { %v134_v14 = vmax.f32 %v132_v12, %v133_v13 }
  0xf1   :  { %v135_v16 = vrot.slane %v134_v14, 2 }
  0xf3   :  { %v136_v17 = vmax.f32 %v134_v14, %v135_v16 }
  0xf5   :  { %v137_v19 = vrot.slane %v136_v17, 1 }
  0xf7   :  { %v138_v21 = vmax.f32 %v136_v17, %v137_v19 }
  0xf9   :  { %v139_v23 = vmax.f32 %v128_v20, %v138_v21 }
  0xfb   :  { %v149_v24 = vrot.slane %v139_v23, %v148_v22  ;;  %169 = vst.msk [vmem:[#allocation2] sm:$0x1] %vm44_vm0, %v139_v23  ;;  %v140_v29 = vsub.f32 %v128_v20, %v139_v23 }
  0xfd   :  { %v151_v25 = vsub.f32 %v126_v9, %v149_v24  ;;  %v152_v26 = vsub.f32 %v127_v7, %v149_v24  ;;  %v141_v30 = vmul.f32 1.442695, %v140_v29 }
  0xff   :  { %v153_v27 = vmul.f32 1.442695, %v151_v25  ;;  %v155_v28 = vmul.f32 1.442695, %v152_v26 }
 0x101   :  { %213 = vpow2.f32 %v153_v27 }
 0x102   :  { %215 = vpow2.f32 %v155_v28  ;;  %v173_v49 = vld [vmem:[#allocation2] sm:$0x1] }
 0x103   :  { %217 = vpow2.f32 %v141_v30 }
 0x10e   :  { %v214_v31 = vpop.eup %213 }
 0x10f   :  { %v216_v32 = vpop.eup %215  ;;  %v157_v33 = vsel %vm129_vm1, %v214_v31, 0.0 }
 0x110   :  { %v158_v34 = vsel %vm129_vm1, %v216_v32, 0.0  ;;  %v218_v40 = vpop.eup %217 }
 0x111   :  { %v159_v35 = vadd.f32 %v158_v34, %v157_v33  ;;  %v144_v43 = vmul.f32 %v218_v40, %v143_v41 }
 0x113   :  { %v160_v36 = vrot.slane %v159_v35, 4 }
 0x115   :  { %v161_v37 = vadd.f32 %v160_v36, %v159_v35 }
 0x117   :  { %v162_v38 = vrot.slane %v161_v37, 2 }
 0x119   :  { %v163_v39 = vadd.f32 %v162_v38, %v161_v37 }
 0x11b   :  { %v164_v42 = vrot.slane %v163_v39, 1 }
 0x11d   :  { %v165_v44 = vadd.f32 %v164_v42, %v163_v39 }
 0x11f   :  { %v166_v45 = vadd.f32 %v165_v44, %v144_v43 }
 0x121   :  { %168 = vst.msk [vmem:[#allocation3] sm:$0x1] %vm44_vm0, %v166_v45 }
 0x128   :  { %v174_v46 = vld [vmem:[#allocation3] sm:$0x1] }
 0x129   :  { %219 = vlog2.f32 %v174_v46 }
 0x136   :  { %v220_v47 = vpop.eup %219 }
 0x137   :  { %v176_v48 = vmul.f32 0.6931472, %v220_v47 }
 0x139   :  { %v177_v50 = vadd.f32 %v176_v48, %v173_v49 }
 0x13b   :  { %178 = vst.msk [vmem:[#allocation9] sm:$0x1] %vm44_vm0, %v177_v50 }
 0x13c   :  { %272 = shalt.err (!%p269_p0)
}
 0x13d   :  { %188 = dma.vmem_to_hbm [thread:$0]  %s186_s1, 16, %s329_s2, [#allocation6]  }
 0x13e   :  { %285 = dma.done.wait [#allocation6], 16  }
 0x13f   :  { %286 = vsyncadd [#allocation6], 4294967280 }
 0x140   :  { %192 = vsyncpa [#allocation5], 1 }
 0x141   :  { %193 = vsyncpa [#allocation8], 1 }
 0x142   :  { %194 = vsyncpa [#allocation6], 1 }

</bundles_post_ra>
